<compile_context>
chip_gen: v6e
topology: v6e:2x2x1
jax: 0.10.0
libtpu: 0.0.40
codegen_flags: <defaults>
</compile_context>

<pallas_src>
import functools

import jax
import jax.numpy as jnp
from jax.experimental import pallas as pl
from jax.experimental.pallas import tpu as pltpu


def _dice_partial_kernel(x_ref, t_ref, inter_ref, card_ref, *,
                         n_chunks, chunk_rows, unroll):
    """Accumulates per-channel intersection / cardinality partial sums.

    x_ref, t_ref:        (1, C, 1, RB, 128)  input tiles (original dtype)
    inter_ref, card_ref: (1, C, 1, 8, 128)   f32 accumulators (revisited
                                             output blocks, resident across k)
    """
    k = pl.program_id(2)

    @pl.when(k == 0)
    def _init():
        inter_ref[...] = jnp.zeros_like(inter_ref)
        card_ref[...] = jnp.zeros_like(card_ref)

    def chunk(g, carry):
        i_acc, c_acc = carry                     # (C, 8, 128) f32 each
        start = g * chunk_rows
        if not isinstance(start, int):
            start = pl.multiple_of(start, chunk_rows)
        # Small chunk -> live intermediates stay at vreg-group size.
        xg = x_ref[0, :, 0, pl.ds(start, chunk_rows), :].astype(jnp.float32)
        tg = t_ref[0, :, 0, pl.ds(start, chunk_rows), :].astype(jnp.float32)
        # sigmoid(x) == 0.5 * tanh(0.5 * x) + 0.5 : one EUP push + one VPU FMA.
        p = 0.5 * jnp.tanh(0.5 * xg) + 0.5       # (C, chunk_rows, 128)
        ip = tg * p                              # intersection contributions
        cp = tg + p                              # cardinality contributions
        # Fold chunk_rows sublane rows into the 8-row accumulators with pure
        # vreg-aligned VPU adds (static, (8,128)-aligned slices; no XLU).
        for r in range(chunk_rows // 8):
            sl = slice(r * 8, (r + 1) * 8)
            i_acc = i_acc + ip[:, sl, :]
            c_acc = c_acc + cp[:, sl, :]
        return i_acc, c_acc

    carry0 = (inter_ref[0, :, 0], card_ref[0, :, 0])
    if n_chunks == 1:
        i_acc, c_acc = chunk(0, carry0)
    else:
        i_acc, c_acc = jax.lax.fori_loop(0, n_chunks, chunk, carry0,
                                         unroll=unroll)
    inter_ref[0, :, 0] = i_acc
    card_ref[0, :, 0] = c_acc


def dice_loss(logits, targets, eps: float = 1e-8, *,
              vmem_budget_bytes: int = 24 * 1024 * 1024):
    """Matches torch DiceLoss.forward: returns a scalar float32."""
    N, C, H, W = logits.shape
    HW = H * W

    # Free, contiguous view: NCHW -> (N, C, H*W).  No transpose, no astype.
    x = logits.reshape(N, C, HW)
    t = targets.reshape(N, C, HW)

    # ---- Chunk size (rows processed per inner-loop step) -------------------
    # Keep per-chunk temporaries at a few vregs; respect sub-32-bit packing.
    min_itemsize = min(x.dtype.itemsize, t.dtype.itemsize)
    min_rows = 8 * max(1, 4 // max(min_itemsize, 1))       # 8 f32 / 16 bf16 / 32 i8
    chunk_rows = max(min_rows, 8 * max(1, 8 // C))         # fill ~8 vregs per temp

    n128 = -(-HW // 128)                                    # 128-lane rows needed

    # ---- Optional core-split of the reduction axis (helps v7x when N odd) --
    split = 2 if (N % 2 == 1 and n128 >= 2 * chunk_rows) else 1

    # ---- VMEM accounting & row-block (RB) selection -------------------------
    out_bytes = 2 * C * 8 * 128 * 4                          # resident accumulators
    row_bytes = 2 * C * 128 * (x.dtype.itemsize + t.dtype.itemsize)  # dbl-buffered in
    budget = max(vmem_budget_bytes, out_bytes + chunk_rows * row_bytes + (2 << 20))
    rb_cap = max(chunk_rows,
                 ((budget - out_bytes) // row_bytes) // chunk_rows * chunk_rows)

    rows_per_split = -(-n128 // split)
    k_steps = -(-rows_per_split // rb_cap)
    rb = -(-rows_per_split // k_steps)
    RB = -(-rb // chunk_rows) * chunk_rows                   # multiple of chunk_rows
    rows_total = split * k_steps * RB
    hw_pad = rows_total * 128
    n_chunks = RB // chunk_rows

    # Actual compiler VMEM limit: accounted blocks + headroom for temporaries.
    vmem_limit = min(56 * 1024 * 1024, budget + (8 << 20))

    # ---- Pad H*W so every block is fully in-bounds (no per-step masking) ---
    # Sentinel logits -> sigmoid == 0 exactly; targets -> 0, so padded columns
    # contribute nothing to either sum.
    if hw_pad != HW:
        if jnp.issubdtype(x.dtype, jnp.floating):
            sentinel = jnp.finfo(x.dtype).min
        elif jnp.issubdtype(x.dtype, jnp.integer):
            sentinel = jnp.iinfo(x.dtype).min
        else:
            sentinel = 0  # TODO(synk): unusual (e.g. bool) logits dtype.
        x = jnp.pad(x, ((0, 0), (0, 0), (0, hw_pad - HW)), constant_values=sentinel)
        t = jnp.pad(t, ((0, 0), (0, 0), (0, hw_pad - HW)), constant_values=0)

    # Free reshape: sublanes are filled by spatial rows, lanes by 128 columns.
    x = x.reshape(N, C, split, k_steps * RB, 128)
    t = t.reshape(N, C, split, k_steps * RB, 128)

    # Inner-loop unrolling: full for short loops, else a dividing factor.
    if n_chunks <= 8:
        unroll = max(n_chunks, 1)
    elif n_chunks % 4 == 0:
        unroll = 4
    elif n_chunks % 2 == 0:
        unroll = 2
    else:
        unroll = 1

    kernel = functools.partial(_dice_partial_kernel, n_chunks=n_chunks,
                               chunk_rows=chunk_rows, unroll=unroll)

    inter_p, card_p = pl.pallas_call(
        kernel,
        out_shape=(
            jax.ShapeDtypeStruct((N, C, split, 8, 128), jnp.float32),
            jax.ShapeDtypeStruct((N, C, split, 8, 128), jnp.float32),
        ),
        grid_spec=pltpu.PrefetchScalarGridSpec(
            num_scalar_prefetch=0,
            grid=(N, split, k_steps),
            in_specs=[
                pl.BlockSpec((1, C, 1, RB, 128), lambda n, s, k: (n, 0, s, k, 0)),
                pl.BlockSpec((1, C, 1, RB, 128), lambda n, s, k: (n, 0, s, k, 0)),
            ],
            out_specs=[
                pl.BlockSpec((1, C, 1, 8, 128), lambda n, s, k: (n, 0, s, 0, 0)),
                pl.BlockSpec((1, C, 1, 8, 128), lambda n, s, k: (n, 0, s, 0, 0)),
            ],
        ),
        compiler_params=pltpu.CompilerParams(
            dimension_semantics=("parallel", "parallel", "arbitrary"),
            vmem_limit_bytes=vmem_limit,
        ),
    )(x, t)

    # Tiny scalar epilogue in plain JAX (a handful of FLOPs).
    intersection = jnp.maximum(jnp.sum(inter_p, axis=(0, 2, 3, 4)), eps)   # (C,)
    cardinality = jnp.maximum(jnp.sum(card_p, axis=(0, 2, 3, 4)), eps)     # (C,)
    dice_coefficient = (2.0 * intersection + eps) / (cardinality + eps)
    return jnp.mean(1.0 - dice_coefficient)


def dice_loss_ref(logits, targets, eps: float = 1e-8):
    """Pure-JAX reference mirroring the PyTorch module."""
    probas = jax.nn.sigmoid(logits.astype(jnp.float32))
    tg = targets.astype(jnp.float32)
    intersection = jnp.maximum((tg * probas).sum((0, 2, 3)), eps)
    cardinality = jnp.maximum((tg + probas).sum((0, 2, 3)), eps)
    dice_coefficient = (2.0 * intersection + eps) / (cardinality + eps)
    return jnp.mean(1.0 - dice_coefficient)


if __name__ == "__main__":
    key = jax.random.PRNGKey(0)
    k1, k2 = jax.random.split(key)

    N, C, H, W = 2, 4, 16, 16
    logits = jax.random.normal(k1, (N, C, H, W), dtype=jnp.float32)
    # Binary-ish targets, like segmentation masks.
    targets = (jax.random.uniform(k2, (N, C, H, W)) > 0.5).astype(jnp.float32)

    out = dice_loss(logits, targets)
    out = jax.block_until_ready(out)

    ref = dice_loss_ref(logits, targets)
    # Tolerance covers the EUP tanh-based sigmoid approximation.
    assert jnp.allclose(out, ref, atol=1e-4, rtol=1e-4), (out, ref)

    print("KERNEL_OK")
</pallas_src>

<mosaic_0001>
module attributes {stable_mosaic.version = 11 : i64} {
  func.func @_dice_partial_kernel(%arg0: i32, %arg1: i32, %arg2: i32, %arg3: memref<1x4x1x16x128xf32, #tpu.memory_space<vmem>>, %arg4: memref<1x4x1x16x128xf32, #tpu.memory_space<vmem>>, %arg5: memref<1x4x1x8x128xf32, #tpu.memory_space<vmem>>, %arg6: memref<1x4x1x8x128xf32, #tpu.memory_space<vmem>>) attributes {dimension_semantics = [#tpu.dimension_semantics<parallel>, #tpu.dimension_semantics<parallel>, #tpu.dimension_semantics<arbitrary>], iteration_bounds = array<i64: 2, 1, 1>, scalar_prefetch = 0 : i64, scratch_operands = 0 : i64, tpu.core_type = #tpu.core_type<tc>, window_params = [{transform_indices = @transform_0, window_bounds = array<i64: 1, 4, 1, 16, 128>}, {transform_indices = @transform_1, window_bounds = array<i64: 1, 4, 1, 16, 128>}, {transform_indices = @transform_2, window_bounds = array<i64: 1, 4, 1, 8, 128>}, {transform_indices = @transform_3, window_bounds = array<i64: 1, 4, 1, 8, 128>}]} {
    %c0_i32 = arith.constant 0 : i32
    %0 = arith.cmpi eq, %arg2, %c0_i32 : i32
    %1 = arith.extui %0 : i1 to i32
    %c0_i32_0 = arith.constant 0 : i32
    %2 = arith.cmpi ne, %1, %c0_i32_0 : i32
    scf.if %2 {
      %cst_32 = arith.constant 0.000000e+00 : f32
      %34 = vector.broadcast %cst_32 : f32 to vector<1x4x1x8x128xf32>
      %c0_33 = arith.constant 0 : index
      %c0_34 = arith.constant 0 : index
      %c0_35 = arith.constant 0 : index
      %c0_36 = arith.constant 0 : index
      %c0_37 = arith.constant 0 : index
      %35 = vector.load %arg5[%c0_33, %c0_34, %c0_35, %c0_36, %c0_37] : memref<1x4x1x8x128xf32, #tpu.memory_space<vmem>>, vector<1x4x1x8x128xf32>
      tpu.vector_store %arg5[%c0_33, %c0_34, %c0_35, %c0_36, %c0_37], %34 {strides = array<i32>} : memref<1x4x1x8x128xf32, #tpu.memory_space<vmem>>, vector<1x4x1x8x128xf32>,
      %cst_38 = arith.constant 0.000000e+00 : f32
      %36 = vector.broadcast %cst_38 : f32 to vector<1x4x1x8x128xf32>
      %c0_39 = arith.constant 0 : index
      %c0_40 = arith.constant 0 : index
      %c0_41 = arith.constant 0 : index
      %c0_42 = arith.constant 0 : index
      %c0_43 = arith.constant 0 : index
      %37 = vector.load %arg6[%c0_39, %c0_40, %c0_41, %c0_42, %c0_43] : memref<1x4x1x8x128xf32, #tpu.memory_space<vmem>>, vector<1x4x1x8x128xf32>
      tpu.vector_store %arg6[%c0_39, %c0_40, %c0_41, %c0_42, %c0_43], %36 {strides = array<i32>} : memref<1x4x1x8x128xf32, #tpu.memory_space<vmem>>, vector<1x4x1x8x128xf32>,
    } else {
    }
    %c0 = arith.constant 0 : index
    %c0_1 = arith.constant 0 : index
    %c0_2 = arith.constant 0 : index
    %c0_3 = arith.constant 0 : index
    %c0_4 = arith.constant 0 : index
    %3 = vector.load %arg5[%c0, %c0_1, %c0_2, %c0_3, %c0_4] : memref<1x4x1x8x128xf32, #tpu.memory_space<vmem>>, vector<1x4x1x8x128xf32>
    %4 = vector.shape_cast %3 : vector<1x4x1x8x128xf32> to vector<4x8x128xf32>
    %c0_5 = arith.constant 0 : index
    %c0_6 = arith.constant 0 : index
    %c0_7 = arith.constant 0 : index
    %c0_8 = arith.constant 0 : index
    %c0_9 = arith.constant 0 : index
    %5 = vector.load %arg6[%c0_5, %c0_6, %c0_7, %c0_8, %c0_9] : memref<1x4x1x8x128xf32, #tpu.memory_space<vmem>>, vector<1x4x1x8x128xf32>
    %6 = vector.shape_cast %5 : vector<1x4x1x8x128xf32> to vector<4x8x128xf32>
    %c0_10 = arith.constant 0 : index
    %c0_11 = arith.constant 0 : index
    %c0_12 = arith.constant 0 : index
    %c0_13 = arith.constant 0 : index
    %c0_14 = arith.constant 0 : index
    %7 = vector.load %arg3[%c0_10, %c0_11, %c0_12, %c0_13, %c0_14] : memref<1x4x1x16x128xf32, #tpu.memory_space<vmem>>, vector<1x4x1x16x128xf32>
    %8 = vector.shape_cast %7 : vector<1x4x1x16x128xf32> to vector<4x16x128xf32>
    %c0_15 = arith.constant 0 : index
    %c0_16 = arith.constant 0 : index
    %c0_17 = arith.constant 0 : index
    %c0_18 = arith.constant 0 : index
    %c0_19 = arith.constant 0 : index
    %9 = vector.load %arg4[%c0_15, %c0_16, %c0_17, %c0_18, %c0_19] : memref<1x4x1x16x128xf32, #tpu.memory_space<vmem>>, vector<1x4x1x16x128xf32>
    %10 = vector.shape_cast %9 : vector<1x4x1x16x128xf32> to vector<4x16x128xf32>
    %cst = arith.constant 5.000000e-01 : f32
    %11 = vector.broadcast %cst : f32 to vector<4x16x128xf32>
    %12 = arith.mulf %11, %8 : vector<4x16x128xf32>
    %13 = math.tanh %12 : vector<4x16x128xf32>
    %cst_20 = arith.constant 5.000000e-01 : f32
    %14 = vector.broadcast %cst_20 : f32 to vector<4x16x128xf32>
    %15 = arith.mulf %14, %13 : vector<4x16x128xf32>
    %cst_21 = arith.constant 5.000000e-01 : f32
    %16 = vector.broadcast %cst_21 : f32 to vector<4x16x128xf32>
    %17 = arith.addf %15, %16 : vector<4x16x128xf32>
    %18 = arith.mulf %10, %17 : vector<4x16x128xf32>
    %19 = arith.addf %10, %17 : vector<4x16x128xf32>
    %20 = vector.extract_strided_slice %18 {offsets = [0, 0, 0], sizes = [4, 8, 128], strides = [1, 1, 1]} : vector<4x16x128xf32> to vector<4x8x128xf32>
    %21 = arith.addf %4, %20 : vector<4x8x128xf32>
    %22 = vector.extract_strided_slice %19 {offsets = [0, 0, 0], sizes = [4, 8, 128], strides = [1, 1, 1]} : vector<4x16x128xf32> to vector<4x8x128xf32>
    %23 = arith.addf %6, %22 : vector<4x8x128xf32>
    %24 = vector.extract_strided_slice %18 {offsets = [0, 8, 0], sizes = [4, 8, 128], strides = [1, 1, 1]} : vector<4x16x128xf32> to vector<4x8x128xf32>
    %25 = arith.addf %21, %24 : vector<4x8x128xf32>
    %26 = vector.extract_strided_slice %19 {offsets = [0, 8, 0], sizes = [4, 8, 128], strides = [1, 1, 1]} : vector<4x16x128xf32> to vector<4x8x128xf32>
    %27 = arith.addf %23, %26 : vector<4x8x128xf32>
    %c0_22 = arith.constant 0 : index
    %c0_23 = arith.constant 0 : index
    %c0_24 = arith.constant 0 : index
    %c0_25 = arith.constant 0 : index
    %c0_26 = arith.constant 0 : index
    %28 = vector.load %arg5[%c0_22, %c0_23, %c0_24, %c0_25, %c0_26] : memref<1x4x1x8x128xf32, #tpu.memory_space<vmem>>, vector<1x4x1x8x128xf32>
    %29 = vector.shape_cast %28 : vector<1x4x1x8x128xf32> to vector<4x8x128xf32>
    %30 = vector.shape_cast %25 : vector<4x8x128xf32> to vector<1x4x1x8x128xf32>
    tpu.vector_store %arg5[%c0_22, %c0_23, %c0_24, %c0_25, %c0_26], %30 {strides = array<i32>} : memref<1x4x1x8x128xf32, #tpu.memory_space<vmem>>, vector<1x4x1x8x128xf32>,
    %c0_27 = arith.constant 0 : index
    %c0_28 = arith.constant 0 : index
    %c0_29 = arith.constant 0 : index
    %c0_30 = arith.constant 0 : index
    %c0_31 = arith.constant 0 : index
    %31 = vector.load %arg6[%c0_27, %c0_28, %c0_29, %c0_30, %c0_31] : memref<1x4x1x8x128xf32, #tpu.memory_space<vmem>>, vector<1x4x1x8x128xf32>
    %32 = vector.shape_cast %31 : vector<1x4x1x8x128xf32> to vector<4x8x128xf32>
    %33 = vector.shape_cast %27 : vector<4x8x128xf32> to vector<1x4x1x8x128xf32>
    tpu.vector_store %arg6[%c0_27, %c0_28, %c0_29, %c0_30, %c0_31], %33 {strides = array<i32>} : memref<1x4x1x8x128xf32, #tpu.memory_space<vmem>>, vector<1x4x1x8x128xf32>,
    return
  }
  func.func @transform_0(%arg0: i32, %arg1: i32, %arg2: i32) -> (i32, i32, i32, i32, i32) {
    %c0_i32 = arith.constant 0 : i32
    %c0_i32_0 = arith.constant 0 : i32
    %c0_i32_1 = arith.constant 0 : i32
    return %arg0, %c0_i32, %arg1, %arg2, %c0_i32_0 : i32, i32, i32, i32, i32
  }
  func.func @transform_1(%arg0: i32, %arg1: i32, %arg2: i32) -> (i32, i32, i32, i32, i32) {
    %c0_i32 = arith.constant 0 : i32
    %c0_i32_0 = arith.constant 0 : i32
    %c0_i32_1 = arith.constant 0 : i32
    return %arg0, %c0_i32, %arg1, %arg2, %c0_i32_0 : i32, i32, i32, i32, i32
  }
  func.func @transform_2(%arg0: i32, %arg1: i32, %arg2: i32) -> (i32, i32, i32, i32, i32) {
    %c0_i32 = arith.constant 0 : i32
    %c0_i32_0 = arith.constant 0 : i32
    %c0_i32_1 = arith.constant 0 : i32
    %c0_i32_2 = arith.constant 0 : i32
    return %arg0, %c0_i32, %arg1, %c0_i32_0, %c0_i32_1 : i32, i32, i32, i32, i32
  }
  func.func @transform_3(%arg0: i32, %arg1: i32, %arg2: i32) -> (i32, i32, i32, i32, i32) {
    %c0_i32 = arith.constant 0 : i32
    %c0_i32_0 = arith.constant 0 : i32
    %c0_i32_1 = arith.constant 0 : i32
    %c0_i32_2 = arith.constant 0 : i32
    return %arg0, %c0_i32, %arg1, %c0_i32_0, %c0_i32_1 : i32, i32, i32, i32, i32
  }
}

</mosaic_0001>

<bundles_post_ra>
// kernel: tpu_custom_call.1
= control target key start
LH: loop header
LB: loop body
LE: loop exit
PB: predicated region body
PF: predicated region fallthrough
CT: control target
= control target key end

     0   :  { %s1136_s0 = inlined_call_operand.hbm [shape: f32[2,4,1,16,128], index: 0, kind: input, shape index: {}]   ;;  %s1137_s1 = inlined_call_operand.hbm [shape: f32[2,4,1,16,128], index: 1, kind: input, shape index: {}]   ;;  %s1138_s2 = inlined_call_operand.hbm [shape: f32[2,4,1,8,128], index: 2, kind: output, shape index: {0}]   ;;  %s1139_s3 = inlined_call_operand.hbm [shape: f32[2,4,1,8,128], index: 3, kind: output, shape index: {1}]  }
   0x1   :  { %1140 = sst [smem:[#allocation14_spill]] %s1136_s0 }
   0x2   :  { %9 = vsyncpa [#allocation3], 0 }
   0x3   :  { %11 = vsyncpa [#allocation3 + $0x1], 0 }
   0x4   :  { %12 = vsyncpa [#allocation6], 0 }
   0x5   :  { %14 = vsyncpa [#allocation6 + $0x1], 0 }
   0x6   :  { %15 = vsyncpa [#allocation4], 0 }
   0x7   :  { %17 = vsyncpa [#allocation4 + $0x1], 0 }
   0x8   :  { %18 = vsyncpa [#allocation9], 0 }
   0x9   :  { %20 = vsyncpa [#allocation9 + $0x1], 0  ;;  %s899_s12 = smov 0   ;;  %s901_s13 = smov 0  }
   0xa   :  { %s903_s14 = smov 0   ;;  %s905_s15 = smov 0  }
   0xb   :  { %s907_s16 = smov 0   ;;  %s909_s17 = smov 0  }
   0xc LB: > { %s579_s18 = sadd.s32 4294967295, %s869_s17   ;;  %s580_s19 = sadd.s32 4294967294, %s869_s17   ;;  %s869_s17 = sphi %s909_s17, %s26_s17   ;;  %s865_s16 = sphi %s907_s16, %s1152_s16   ;;  %s861_s15 = sphi %s905_s15, %s1151_s15   ;;  %s857_s14 = sphi %s903_s14, %s1150_s14   ;;  %s853_s13 = sphi %s901_s13, %s1149_s13   ;;  %s849_s12 = sphi %s899_s12, %s1148_s12  }
   0xd   : > { %s45_s20 = sadd.s32 1, %s865_s16  ;;  %s56_s21 = sadd.s32 1, %s857_s14 }
   0xe   : > { %p47_p0 = scmp.ge.s32.totalorder %s45_s20, 2  ;;  %p63_p1 = scmp.ne.s32.totalorder %s857_s14, %s853_s13 }
   0xf   : > { %p64_p2 = scmp.eq.s32.totalorder %s869_s17, 0  ;;  %p69_p3 = scmp.ne.s32.totalorder %s853_s13, %s849_s12 }
  0x10   : > { %s1154_s20 = smov (%p47_p0, %s45_s20), 0  ;;  %p70_p5 = scmp.eq.s32.totalorder %s579_s18, 0 }
  0x11   : > { %p940_p4 = por %p64_p2, %p63_p1  ;;  %s49_s23 = ssub.s32 %s865_s16, %s1154_s20 }
  0x12   : > { %p125_p6 = scmp.eq.s32.totalorder %s579_s18, 1  ;;  %p54_p7 = scmp.eq.s32.totalorder %s49_s23, 0 }
  0x13   : > { %p946_p8 = por %p70_p5, %p69_p3  ;;  %p131_p10 = scmp.eq.s32.totalorder %s580_s19, 1 }
  0x14   : > { %p950_p9 = por %p125_p6, %p63_p1  ;;  %p582_p12 = scmp.ge.s32.totalorder %s869_s17, 2 }
  0x15   : > { %s955_s26 = scalar_select %p54_p7, %s857_s14, %s56_s21  }
  0x16   : > { %p957_p11 = por %p131_p10, %p69_p3  ;;  %p628_p13 = scmp.lt.s32.totalorder %s869_s17, 2 }
  0x17   : > { %s964_s28 = sand.u32 1, %s857_s14   ;;  %s602_s30 = sshll.u32 %s865_s16, 10 }
  0x18   : > { %s583_s29 = sshll.u32 %s964_s28, 6  ;;  %s1145_s0 = sld [smem:[#allocation14_spill]] }
  0x19   : > { %s183_s7 = scalar_lea.vmem [#allocation2], %s583_s29  ;;  %p977_p0 = pnand %p628_p13, %p940_p4 }
  0x1a   : > { %s194_s8 = sshll.u32 %s183_s7, 4  ;;  %p589_p1 = scmp.ge.s32.totalorder %s869_s17, 1  ;;  %s195_s8 = int_to_ptr.vmem [resolvable:$true] %s194_s8 }
  0x1b   : > { %s180_s10 = scalar_lea.sflag [#allocation3], %s964_s28  ;;  %p701_p2 = pneg %p977_p0 }
  0x1c   : > { %s712_s11 = scalar_lea.vmem %s195_s8, 1024  ;;  %s871_s18 = smov [#allocation2]  }
  0x1d   : > { %p713_p3 = scmp.ne.s32.totalorder %s195_s8, %s712_s11  ;;  %s717_s19 = sshll.u32 %s871_s18, 4  ;;  %s718_s19 = int_to_ptr.vmem [resolvable:$false] %s717_s19 }
  0x1e   : > { %s193_s6 = scalar_lea.hbm %s1145_s0, %s602_s30  ;;  %s719_s21 = scalar_lea.vmem %s718_s19, 2048 }
  0x1f   : > { %p715_p5 = pnand %p713_p3, %p701_p2  ;;  %p720_p4 = scmp.lt.s32.totalorder %s195_s8, %s718_s19 }
  0x20   : > { %p721_p7 = scmp.lt.s32.totalorder %s719_s21, %s712_s11 }
  0x21   : > { %p716_p6 = pneg %p715_p5 }
  0x22   : > { %p722_p10 = por %p721_p7, %p720_p4 }
  0x24   : > { %p723_p13 = pnand %p722_p10, %p716_p6 }
  0x26   : > { %726 = shalt.err (!%p723_p13)
}
  0x27   : > { %s872_s22 = smov 128   ;;  %s873_s23 = smov 8  }
  0x28   : > { %617 = dma.hbm_to_vmem [thread:$0]  (!%p977_p0), %s193_s6, 1024, %s195_s8, %s180_s10, %s872_s22, %s872_s22, %s873_s23  }
  0x29   : > { %p227_p3 = scmp.lt.s32.totalorder %s869_s17, 3  ;;  %s218_s7 = scalar_lea.hbm %s1137_s1, %s602_s30 }
  0x2a   : > { %s208_s18 = scalar_lea.vmem [#allocation5], %s583_s29  ;;  %s205_s21 = scalar_lea.sflag [#allocation6], %s964_s28 }
  0x2b   : > { %p998_p5 = pnand %p589_p1, %p227_p3  ;;  %s219_s19 = sshll.u32 %s208_s18, 4  ;;  %s220_s19 = int_to_ptr.vmem [resolvable:$true] %s219_s19 }
  0x2c   : > { %s740_s0 = scalar_lea.vmem %s220_s19, 1024  ;;  %s874_s6 = smov [#allocation5]  }
  0x2d   : > { %p741_p6 = scmp.ne.s32.totalorder %s220_s19, %s740_s0  ;;  %s745_s8 = sshll.u32 %s874_s6, 4  ;;  %s746_s8 = int_to_ptr.vmem [resolvable:$false] %s745_s8 }
  0x2e   : > { %s747_s30 = scalar_lea.vmem %s746_s8, 2048  ;;  %p748_p10 = scmp.lt.s32.totalorder %s220_s19, %s746_s8 }
  0x2f   : > { %p743_p4 = pnand %p741_p6, %p701_p2  ;;  %p749_p1 = scmp.lt.s32.totalorder %s747_s30, %s740_s0 }
  0x31   : > { %p744_p7 = pneg %p743_p4  ;;  %p750_p13 = por %p749_p1, %p748_p10 }
  0x33   : > { %p751_p3 = pnand %p750_p13, %p744_p7 }
  0x35   : > { %754 = shalt.err (!%p751_p3)
}
  0x36   : > { %620 = dma.hbm_to_vmem [thread:$0]  (!%p977_p0), %s218_s7, 1024, %s220_s19, %s205_s21, %s872_s22, %s872_s22, %s873_s23  }
  0x37   : > { %231 = sbr.rel (%p998_p5) target bundleno = 131 (0x83), region = 28  ;;  %s1013_s28 = sand.u32 (!%p998_p5), 1, %s853_s13  }
  0x38   : > { %s590_s29 = sshll.u32 (!%p998_p5), %s1013_s28, 6  ;;  %s234_s10 = scalar_lea.sflag (!%p998_p5), [#allocation3], %s1013_s28 }
  0x39   : > { %s237_s4 = scalar_lea.vmem (!%p998_p5), [#allocation2], %s590_s29 }
  0x3c   : > { %832 = dma.done.wait (%p946_p8), %s234_s10, 1024  }
  0x3d   : > { %834 = vsyncadd (%p946_p8), %s234_s10, 4294966272  ;;  %s243_s0 = scalar_lea.sflag [#allocation6], %s1013_s28  ;;  %s1022_s9 = scalar_lea.vmem [#allocation5], %s590_s29 }
  0x3e   : > { %836 = dma.done.wait (%p946_p8), %s243_s0, 1024  }
  0x3f   : > { %838 = vsyncadd (%p946_p8), %s243_s0, 4294966272  ;;  %v301_v0 = vld [vmem:[%s237_s4] sm:$0xff]  ;;  %v302_v1 = vld [vmem:[%s237_s4 + $0x8] sm:$0xff]  ;;  %s592_s24 = sshll.u32 %s1013_s28, 5  ;;  %s604_s22 = sshll.u32 %s861_s15, 9 }
  0x40   : > { %v317_v2 = vmul.f32 0.5, %v301_v0  ;;  %v318_v3 = vmul.f32 0.5, %v302_v1  ;;  %v303_v4 = vld [vmem:[%s237_s4 + $0x10] sm:$0xff]  ;;  %v304_v5 = vld [vmem:[%s237_s4 + $0x18] sm:$0xff]  ;;  %v305_v8 = vld [vmem:[%s237_s4 + $0x20] sm:$0xff]  ;;  %s271_s23 = scalar_lea.vmem [#allocation7], %s592_s24  ;;  %s1048_s18 = scalar_lea.hbm %s1138_s2, %s604_s22 }
  0x41   : > { %v319_v6 = vmul.f32 0.5, %v303_v4  ;;  %v320_v7 = vmul.f32 0.5, %v304_v5  ;;  %v306_v9 = vld [vmem:[%s237_s4 + $0x28] sm:$0xff]  ;;  %v321_v10 = vmul.f32 0.5, %v305_v8  ;;  %v307_v12 = vld [vmem:[%s237_s4 + $0x30] sm:$0xff]  ;;  %v308_v13 = vld [vmem:[%s237_s4 + $0x38] sm:$0xff]  ;;  %s1057_s8 = scalar_lea.hbm %s1139_s3, %s604_s22 }
  0x42   : > { %683 = vtanh.f32 %v317_v2  ;;  %v322_v11 = vmul.f32 0.5, %v306_v9  ;;  %v323_v14 = vmul.f32 0.5, %v307_v12  ;;  %v324_v15 = vmul.f32 0.5, %v308_v13  ;;  %v309_v20 = vld [vmem:[%s1022_s9] sm:$0xff]  ;;  %v310_v23 = vld [vmem:[%s1022_s9 + $0x8] sm:$0xff]  ;;  %v311_v28 = vld [vmem:[%s1022_s9 + $0x10] sm:$0xff] }
  0x43   : > { %685 = vtanh.f32 %v318_v3  ;;  %v312_v32 = vld [vmem:[%s1022_s9 + $0x18] sm:$0xff]  ;;  %v313_v39 = vld [vmem:[%s1022_s9 + $0x20] sm:$0xff]  ;;  %v314_v44 = vld [vmem:[%s1022_s9 + $0x28] sm:$0xff]  ;;  %s409_s5 = sshll.u32 %s271_s23, 4  ;;  %s1042_s7 = scalar_lea.vmem [#allocation8], %s592_s24  ;;  %s1050_s5 = int_to_ptr.vmem [resolvable:$true] %s409_s5 }
  0x44   : > { %687 = vtanh.f32 %v319_v6  ;;  %v315_v49 = vld [vmem:[%s1022_s9 + $0x30] sm:$0xff]  ;;  %v316_v53 = vld [vmem:[%s1022_s9 + $0x38] sm:$0xff]  ;;  %s426_s19 = sshll.u32 %s1042_s7, 4  ;;  %s390_s30 = scalar_lea.sflag [#allocation4], %s1013_s28  ;;  %s1059_s19 = int_to_ptr.vmem [resolvable:$true] %s426_s19 }
  0x45   : > { %689 = vtanh.f32 %v320_v7  ;;  %s755_s29 = scalar_lea.vmem %s1050_s5, 512  ;;  %s875_s10 = smov [#allocation7]  }
  0x46   : > { %691 = vtanh.f32 %v321_v10  ;;  %p756_p8 = scmp.ne.s32.totalorder %s1050_s5, %s755_s29  ;;  %s759_s4 = sshll.u32 %s875_s10, 4  ;;  %s760_s4 = int_to_ptr.vmem [resolvable:$false] %s759_s4 }
  0x47   : > { %693 = vtanh.f32 %v322_v11  ;;  %s761_s0 = scalar_lea.vmem %s760_s4, 1024  ;;  %p762_p5 = scmp.lt.s32.totalorder %s1050_s5, %s760_s4 }
  0x48   : > { %695 = vtanh.f32 %v323_v14  ;;  %p757_p0 = pnand %p756_p8, %p950_p9  ;;  %p763_p6 = scmp.lt.s32.totalorder %s761_s0, %s755_s29 }
  0x49   : > { %697 = vtanh.f32 %v324_v15 }
  0x4a   : > { %p758_p2 = pneg %p757_p0  ;;  %p764_p4 = por %p763_p6, %p762_p5 }
  0x4c   : > { %p765_p7 = pnand %p764_p4, %p758_p2 }
  0x4f   : > { %v684_v16 = vpop.eup %683 }
  0x50   : > { %v686_v17 = vpop.eup %685  ;;  %v333_v18 = vmul.f32 0.5, %v684_v16 }
  0x51   : > { %v688_v19 = vpop.eup %687  ;;  %v334_v21 = vmul.f32 0.5, %v686_v17 }
  0x52   : > { %v690_v22 = vpop.eup %689  ;;  %v341_v24 = vadd.f32 0.5, %v333_v18  ;;  %v335_v25 = vmul.f32 0.5, %v688_v19 }
  0x53   : > { %v692_v26 = vpop.eup %691  ;;  %v342_v27 = vadd.f32 0.5, %v334_v21  ;;  %v336_v29 = vmul.f32 0.5, %v690_v22 }
  0x54   : > { %v694_v30 = vpop.eup %693  ;;  %v349_v31 = vmul.f32 %v341_v24, %v309_v20  ;;  %v343_v33 = vadd.f32 0.5, %v335_v25  ;;  %v337_v34 = vmul.f32 0.5, %v692_v26  ;;  %v357_v35 = vadd.f32 %v341_v24, %v309_v20 }
  0x55   : > { %v696_v36 = vpop.eup %695  ;;  %v350_v37 = vmul.f32 %v342_v27, %v310_v23  ;;  %v344_v38 = vadd.f32 0.5, %v336_v29  ;;  %v338_v40 = vmul.f32 0.5, %v694_v30  ;;  %v358_v41 = vadd.f32 %v342_v27, %v310_v23 }
  0x56   : > { %v698_v42 = vpop.eup %697  ;;  %v351_v43 = vmul.f32 %v343_v33, %v311_v28  ;;  %v345_v45 = vadd.f32 0.5, %v337_v34  ;;  %v339_v46 = vmul.f32 0.5, %v696_v36  ;;  %v359_v58 = vadd.f32 %v343_v33, %v311_v28 }
  0x57   : > { %v352_v47 = vmul.f32 %v344_v38, %v312_v32  ;;  %v346_v48 = vadd.f32 0.5, %v338_v40  ;;  %v340_v50 = vmul.f32 0.5, %v698_v42  ;;  %v373_v51 = vadd.f32 %v350_v37, %v349_v31 }
  0x58   : > { %v353_v52 = vmul.f32 %v345_v45, %v313_v39  ;;  %v347_v54 = vadd.f32 0.5, %v339_v46  ;;  %v377_v57 = vadd.f32 %v358_v41, %v357_v35  ;;  %v360_v61 = vadd.f32 %v344_v38, %v312_v32 }
  0x59   : > { %v354_v55 = vmul.f32 %v346_v48, %v314_v44  ;;  %v348_v56 = vadd.f32 0.5, %v340_v50  ;;  %381 = vst [vmem:[%s271_s23] sm:$0xff] %v373_v51  ;;  %v374_v59 = vadd.f32 %v352_v47, %v351_v43  ;;  %v361_v63 = vadd.f32 %v345_v45, %v313_v39 }
  0x5a   : > { %v355_v60 = vmul.f32 %v347_v54, %v315_v49  ;;  %385 = vst [vmem:[%s1042_s7] sm:$0xff] %v377_v57  ;;  %v362_v0 = vadd.f32 %v346_v48, %v314_v44  ;;  %v363_v2 = vadd.f32 %v347_v54, %v315_v49  ;;  %v378_v4 = vadd.f32 %v360_v61, %v359_v58 }
  0x5b   : > { %v356_v62 = vmul.f32 %v348_v56, %v316_v53  ;;  %382 = vst [vmem:[%s271_s23 + $0x8] sm:$0xff] %v374_v59  ;;  %v375_v1 = vadd.f32 %v354_v55, %v353_v52  ;;  %v364_v3 = vadd.f32 %v348_v56, %v316_v53 }
  0x5c   : > { %386 = vst [vmem:[%s1042_s7 + $0x8] sm:$0xff] %v378_v4  ;;  %v379_v6 = vadd.f32 %v362_v0, %v361_v63 }
  0x5d   : > { %383 = vst [vmem:[%s271_s23 + $0x10] sm:$0xff] %v375_v1  ;;  %v376_v5 = vadd.f32 %v356_v62, %v355_v60  ;;  %v380_v7 = vadd.f32 %v364_v3, %v363_v2 }
  0x5e   : > { %387 = vst [vmem:[%s1042_s7 + $0x10] sm:$0xff] %v379_v6 }
  0x5f   : > { %384 = vst [vmem:[%s271_s23 + $0x18] sm:$0xff] %v376_v5 }
  0x60   : > { %768 = shalt.err (!%p765_p7)
}
  0x61   : > { %s769_s9 = scalar_lea.hbm %s1048_s18, 512  ;;  %s773_s23 = scalar_lea.hbm %s1138_s2, 1024 }
  0x62   : > { %p770_p10 = scmp.ne.s32.totalorder %s1048_s18, %s769_s9  ;;  %p774_p3 = scmp.lt.s32.totalorder %s1048_s18, %s1138_s2 }
  0x63   : > { %p775_p8 = scmp.lt.s32.totalorder %s773_s23, %s769_s9 }
  0x64   : > { %p771_p1 = pnand %p770_p10, %p950_p9 }
  0x65   : > { %p776_p0 = por %p775_p8, %p774_p3 }
  0x66   : > { %p772_p13 = pneg %p771_p1 }
  0x68   : > { %p777_p2 = pnand %p776_p0, %p772_p13 }
  0x6a   : > { %780 = shalt.err (!%p777_p2)
}
  0x6b   : > { %s876_s21 = smov 128   ;;  %s877_s6 = smov 8   ;;  %388 = vst [vmem:[%s1042_s7 + $0x18] sm:$0xff] %v380_v7 }
  0x6c   : > { %610 = dma.vmem_to_hbm [thread:$0]  (%p950_p9), %s1050_s5, 512, %s1048_s18, %s390_s30, %s876_s21, %s876_s21, %s877_s6  }
  0x6d   : > { %s395_s29 = scalar_lea.sflag [#allocation9], %s1013_s28  ;;  %s781_s10 = scalar_lea.vmem %s1059_s19, 512 }
  0x6e   : > { %p782_p5 = scmp.ne.s32.totalorder %s1059_s19, %s781_s10  ;;  %s878_s4 = smov [#allocation8]  }
  0x6f   : > { %s785_s0 = sshll.u32 %s878_s4, 4  ;;  %s786_s0 = int_to_ptr.vmem [resolvable:$false] %s785_s0 }
  0x70   : > { %p783_p6 = pnand %p782_p5, %p950_p9  ;;  %s787_s9 = scalar_lea.vmem %s786_s0, 1024 }
  0x71   : > { %p788_p7 = scmp.lt.s32.totalorder %s1059_s19, %s786_s0  ;;  %p789_p10 = scmp.lt.s32.totalorder %s787_s9, %s781_s10 }
  0x72   : > { %p784_p4 = pneg %p783_p6 }
  0x73   : > { %p790_p1 = por %p789_p10, %p788_p7 }
  0x75   : > { %p791_p13 = pnand %p790_p1, %p784_p4 }
  0x77   : > { %794 = shalt.err (!%p791_p13)
}
  0x78   : > { %s795_s5 = scalar_lea.hbm %s1057_s8, 512  ;;  %s799_s18 = scalar_lea.hbm %s1139_s3, 1024 }
  0x79   : > { %p796_p3 = scmp.ne.s32.totalorder %s1057_s8, %s795_s5  ;;  %p800_p2 = scmp.lt.s32.totalorder %s1057_s8, %s1139_s3 }
  0x7a   : > { %p801_p5 = scmp.lt.s32.totalorder %s799_s18, %s795_s5 }
  0x7b   : > { %p797_p8 = pnand %p796_p3, %p950_p9 }
  0x7c   : > { %p802_p6 = por %p801_p5, %p800_p2 }
  0x7d   : > { %p798_p0 = pneg %p797_p8 }
  0x7f   : > { %p803_p4 = pnand %p802_p6, %p798_p0 }
  0x81   : > { %806 = shalt.err (!%p803_p4)
}
  0x82   : > { %611 = dma.vmem_to_hbm [thread:$0]  (%p950_p9), %s1059_s19, 512, %s1057_s8, %s395_s29, %s876_s21, %s876_s21, %s877_s6  }
  0x83 PF: > { %s441_s22 = sand.u32 1, %s849_s12   ;;  %p622_p7 = pnand %p582_p12, %p957_p11 }
  0x84   : > { %s442_s23 = scalar_lea.sflag [#allocation4], %s441_s22 }
  0x85   : > { %p623_p10 = pneg %p622_p7 }
  0x87   : > { %840 = dma.done.wait (%p623_p10), %s442_s23, 512  }
  0x88   : > { %842 = vsyncadd (%p623_p10), %s442_s23, 4294966784  ;;  %s451_s15 = scalar_lea.sflag [#allocation9], %s441_s22 }
  0x89   : > { %844 = dma.done.wait (%p623_p10), %s451_s15, 512  }
  0x8a   : > { %846 = vsyncadd (%p623_p10), %s451_s15, 4294966784  ;;  %s26_s17 = sadd.s32 1, %s869_s17   ;;  %s1148_s12 = smov %s853_s13 }
  0x8b   : > { %p23_p1 = scmp.ge.s32.totalorder %s26_s17, 4   ;;  %s1149_s13 = smov %s857_s14 }
  0x8c   : > { %s1150_s14 = smov %s955_s26  ;;  %s1151_s15 = smov %s865_s16 }
  0x8d   : > { %s1152_s16 = smov %s1154_s20  ;;  %25 = sbr.rel (!%p23_p1) target bundleno = 12 (0xc), region = 107 }
  0x92   :  { %456 = vsyncpa [#allocation3], 1 }
  0x93   :  { %458 = vsyncpa [#allocation3 + $0x1], 1 }
  0x94   :  { %459 = vsyncpa [#allocation6], 1 }
  0x95   :  { %461 = vsyncpa [#allocation6 + $0x1], 1 }
  0x96   :  { %462 = vsyncpa [#allocation4], 1 }
  0x97   :  { %464 = vsyncpa [#allocation4 + $0x1], 1 }
  0x98   :  { %465 = vsyncpa [#allocation9], 1 }
  0x99   :  { %467 = vsyncpa [#allocation9 + $0x1], 1 }

</bundles_post_ra>
